<compile_context>
chip_gen: v5e
topology: v5e:2x2
jax: 0.10.0
libtpu: 0.0.40
codegen_flags: <defaults>
</compile_context>

<pallas_src>
import functools

import jax
import jax.numpy as jnp
from jax import lax
from jax.experimental import pallas as pl
from jax.experimental.pallas import tpu as pltpu

KSIZE = 5
PAD = 2


def _pick_batch_block(N, Cin, Cout, max_rows=64):
    """Pick NB (images stacked on sublanes per grid step).

    Valid NB: divides N, and both NB*Cin and NB*Cout are multiples of 8 (or the
    block covers the whole array, i.e. NB == N).  Among valid NBs prefer the
    largest one whose row count stays modest, so large N keeps several parallel
    grid steps (good for v7x megacore) while small N fully packs the sublanes.
    """
    valid = []
    for nb in range(1, N + 1):
        if N % nb:
            continue
        if nb == N or ((nb * Cin) % 8 == 0 and (nb * Cout) % 8 == 0):
            valid.append(nb)
    small = [nb for nb in valid if nb * max(Cin, Cout) <= max_rows]
    return max(small) if small else min(valid)


def _head_kernel(x_ref, wdw_ref, b1_ref, wpw_ref, b2_ref, mask_ref, o_ref,
                 *, W, HW, Cin, Cout, NB):
    # x_ref:    (NB*Cin, HW)   NB images stacked on sublanes, H*W on lanes
    # wdw_ref:  (NB*Cin, 25)   depthwise weights (BN1 scale folded, tiled per image)
    # b1_ref:   (NB*Cin, 1)    BN1 bias (tiled per image)
    # wpw_ref:  (Cout, Cin)    pointwise weights (BN2 scale folded)
    # b2_ref:   (Cout, 1)      BN2 bias
    # mask_ref: (2*KSIZE, HW)  rows 0..4 row-edge masks, rows 5..9 col-edge masks
    # o_ref:    (NB*Cout, HW)
    x = x_ref[...]                                                    # (NB*Cin, HW)

    # ---- row-shifted, row-masked copies (5 XLU rolls + 5 mask muls) ----------
    # roll(x, s)[f] == x[(f - s) % HW]; we want tap[f] = x[f + d] => s = -d.
    xs = []
    for kh in range(KSIZE):
        s = (-(kh - PAD) * W) % HW
        xr = pltpu.roll(x, s, 1) if s else x
        xs.append(xr * mask_ref[kh:kh + 1, :])                        # zero rows out of range

    # ---- depthwise 5x5: 25 shifted MACs, column mask applied once per kw -----
    acc = None
    for kw in range(KSIZE):
        s = (-(kw - PAD)) % HW
        part = None
        for kh in range(KSIZE):
            k = kh * KSIZE + kw
            t = pltpu.roll(xs[kh], s, 1) if s else xs[kh]
            t = t * wdw_ref[:, k:k + 1]                               # per-channel scale
            part = t if part is None else part + t
        part = part * mask_ref[KSIZE + kw:KSIZE + kw + 1, :]          # zero cols out of range
        acc = part if acc is None else acc + part

    # ---- BN1 bias + ReLU (BN1 scale already folded into wdw) -----------------
    y = jnp.maximum(acc + b1_ref[...], 0.0)                           # (NB*Cin, HW)

    # ---- pointwise 1x1 conv (BN2 scale folded) + BN2 bias, VPU contraction ---
    for nb in range(NB):
        z = None
        for ci in range(Cin):
            row = nb * Cin + ci
            t = y[row:row + 1, :] * wpw_ref[:, ci:ci + 1]             # (Cout, HW)
            z = t if z is None else z + t
        o_ref[nb * Cout:(nb + 1) * Cout, :] = z + b2_ref[...]         # lane-dense store


@jax.jit
def head_forward(x_nchw, params):
    """x_nchw: (N, Cin, H, W) float32.  Returns (N, Cout, H, W) float32."""
    eps = 1e-5
    N, Cin, H, W = x_nchw.shape
    Cout = params["w_pw"].shape[0]
    HW = H * W

    NB = _pick_batch_block(N, Cin, Cout)
    G = N // NB

    # Fold BatchNorm (inference semantics) into scale/bias, then fold the scales
    # into the conv weights.  Only the bias adds remain in the kernel.
    s1 = params["bn1_gamma"] / jnp.sqrt(params["bn1_var"] + eps)
    b1 = params["bn1_beta"] - params["bn1_mean"] * s1
    s2 = params["bn2_gamma"] / jnp.sqrt(params["bn2_var"] + eps)
    b2 = params["bn2_beta"] - params["bn2_mean"] * s2

    wdw = (params["w_dw"][:, 0, :, :].reshape(Cin, KSIZE * KSIZE)
           * s1[:, None]).astype(jnp.float32)                          # (Cin, 25)
    wdw_t = jnp.tile(wdw, (NB, 1))                                     # (NB*Cin, 25)
    b1_t = jnp.tile(b1.reshape(Cin, 1).astype(jnp.float32), (NB, 1))   # (NB*Cin, 1)
    wpw = (params["w_pw"][:, :, 0, 0] * s2[:, None]).astype(jnp.float32)  # (Cout, Cin)
    b2c = b2.reshape(Cout, 1).astype(jnp.float32)                      # (Cout, 1)

    # Precomputed invariant edge masks (0/1 f32), passed like a weight.
    f_idx = jnp.arange(HW, dtype=jnp.int32)
    r_idx = f_idx // W
    c_idx = f_idx % W
    row_masks = jnp.stack(
        [((r_idx + kh - PAD >= 0) & (r_idx + kh - PAD < H)) for kh in range(KSIZE)])
    col_masks = jnp.stack(
        [((c_idx + kw - PAD >= 0) & (c_idx + kw - PAD < W)) for kw in range(KSIZE)])
    masks = jnp.concatenate([row_masks, col_masks], axis=0).astype(jnp.float32)  # (10, HW)

    # Free reshape (NCHW is row-major contiguous): images stacked on sublanes.
    x_flat = x_nchw.reshape(N * Cin, HW).astype(jnp.float32)

    kernel = functools.partial(_head_kernel, W=W, HW=HW, Cin=Cin, Cout=Cout, NB=NB)

    out_flat = pl.pallas_call(
        kernel,
        out_shape=jax.ShapeDtypeStruct((N * Cout, HW), jnp.float32),
        grid_spec=pltpu.PrefetchScalarGridSpec(
            num_scalar_prefetch=0,
            grid=(G,),
            in_specs=[
                pl.BlockSpec((NB * Cin, HW), lambda g: (g, 0)),            # input block
                pl.BlockSpec((NB * Cin, KSIZE * KSIZE), lambda g: (0, 0)),  # dw weights
                pl.BlockSpec((NB * Cin, 1), lambda g: (0, 0)),              # BN1 bias
                pl.BlockSpec((Cout, Cin), lambda g: (0, 0)),                # pw weights
                pl.BlockSpec((Cout, 1), lambda g: (0, 0)),                  # BN2 bias
                pl.BlockSpec((2 * KSIZE, HW), lambda g: (0, 0)),            # edge masks
            ],
            out_specs=pl.BlockSpec((NB * Cout, HW), lambda g: (g, 0)),
        ),
        compiler_params=pltpu.CompilerParams(dimension_semantics=("parallel",)),
    )(x_flat, wdw_t, b1_t, wpw, b2c, masks)

    # Free reshape back to NCHW.
    return out_flat.reshape(N, Cout, H, W)


def _reference(x_nchw, params):
    """Pure-JAX reference (lax conv) mirroring the PyTorch module in eval mode."""
    eps = 1e-5
    Cin = x_nchw.shape[1]
    y = lax.conv_general_dilated(
        x_nchw, params["w_dw"], window_strides=(1, 1), padding=((PAD, PAD), (PAD, PAD)),
        dimension_numbers=("NCHW", "OIHW", "NCHW"), feature_group_count=Cin)
    s1 = params["bn1_gamma"] / jnp.sqrt(params["bn1_var"] + eps)
    b1 = params["bn1_beta"] - params["bn1_mean"] * s1
    y = y * s1[None, :, None, None] + b1[None, :, None, None]
    y = jnp.maximum(y, 0.0)
    z = lax.conv_general_dilated(
        y, params["w_pw"], window_strides=(1, 1), padding=((0, 0), (0, 0)),
        dimension_numbers=("NCHW", "OIHW", "NCHW"))
    s2 = params["bn2_gamma"] / jnp.sqrt(params["bn2_var"] + eps)
    b2 = params["bn2_beta"] - params["bn2_mean"] * s2
    return z * s2[None, :, None, None] + b2[None, :, None, None]


def init_params(key, Cin, Cout):
    ks = jax.random.split(key, 10)
    return {
        "w_dw": jax.random.normal(ks[0], (Cin, 1, KSIZE, KSIZE), jnp.float32) * 0.1,
        "w_pw": jax.random.normal(ks[1], (Cout, Cin, 1, 1), jnp.float32) * 0.1,
        "bn1_gamma": jax.random.normal(ks[2], (Cin,), jnp.float32) * 0.1 + 1.0,
        "bn1_beta": jax.random.normal(ks[3], (Cin,), jnp.float32) * 0.1,
        "bn1_mean": jax.random.normal(ks[4], (Cin,), jnp.float32) * 0.1,
        "bn1_var": jnp.abs(jax.random.normal(ks[5], (Cin,), jnp.float32)) * 0.1 + 1.0,
        "bn2_gamma": jax.random.normal(ks[6], (Cout,), jnp.float32) * 0.1 + 1.0,
        "bn2_beta": jax.random.normal(ks[7], (Cout,), jnp.float32) * 0.1,
        "bn2_mean": jax.random.normal(ks[8], (Cout,), jnp.float32) * 0.1,
        "bn2_var": jnp.abs(jax.random.normal(ks[9], (Cout,), jnp.float32)) * 0.1 + 1.0,
    }


if __name__ == "__main__":
    key = jax.random.PRNGKey(0)
    k_x, k_p = jax.random.split(key)

    N, Cin, H, W, Cout = 2, 4, 16, 16, 8
    x = jax.random.normal(k_x, (N, Cin, H, W), jnp.float32)
    params = init_params(k_p, Cin, Cout)

    out = jax.block_until_ready(head_forward(x, params))
    ref = jax.block_until_ready(_reference(x, params))

    assert out.shape == (N, Cout, H, W)
    assert jnp.allclose(out, ref, atol=1e-4, rtol=1e-4), float(jnp.max(jnp.abs(out - ref)))
    print("KERNEL_OK")
</pallas_src>

<mosaic_0001>
module attributes {stable_mosaic.version = 11 : i64} {
  func.func @_head_kernel(%arg0: i32, %arg1: memref<8x256xf32, #tpu.memory_space<vmem>>, %arg2: memref<8x25xf32, #tpu.memory_space<vmem>>, %arg3: memref<8x1xf32, #tpu.memory_space<vmem>>, %arg4: memref<8x4xf32, #tpu.memory_space<vmem>>, %arg5: memref<8x1xf32, #tpu.memory_space<vmem>>, %arg6: memref<10x256xf32, #tpu.memory_space<vmem>>, %arg7: memref<16x256xf32, #tpu.memory_space<vmem>>) attributes {dimension_semantics = [#tpu.dimension_semantics<parallel>], iteration_bounds = array<i64: 1>, scalar_prefetch = 0 : i64, scratch_operands = 0 : i64, tpu.core_type = #tpu.core_type<tc>, window_params = [{transform_indices = @transform_0, window_bounds = array<i64: 8, 256>}, {pipeline_mode = #tpu.pipeline_mode<synchronous>, transform_indices = @transform_1, window_bounds = array<i64: 8, 25>}, {pipeline_mode = #tpu.pipeline_mode<synchronous>, transform_indices = @transform_2, window_bounds = array<i64: 8, 1>}, {pipeline_mode = #tpu.pipeline_mode<synchronous>, transform_indices = @transform_3, window_bounds = array<i64: 8, 4>}, {pipeline_mode = #tpu.pipeline_mode<synchronous>, transform_indices = @transform_4, window_bounds = array<i64: 8, 1>}, {pipeline_mode = #tpu.pipeline_mode<synchronous>, transform_indices = @transform_5, window_bounds = array<i64: 10, 256>}, {transform_indices = @transform_6, window_bounds = array<i64: 16, 256>}]} {
    %c0 = arith.constant 0 : index
    %c0_0 = arith.constant 0 : index
    %0 = vector.load %arg1[%c0, %c0_0] : memref<8x256xf32, #tpu.memory_space<vmem>>, vector<8x256xf32>
    %c32_i32 = arith.constant 32 : i32
    %1 = tpu.dynamic_rotate %0 by %c32_i32 dim 1 : vector<8x256xf32>, i32 -> vector<8x256xf32>
    %c0_1 = arith.constant 0 : index
    %c0_2 = arith.constant 0 : index
    %2 = vector.load %arg6[%c0_1, %c0_2] : memref<10x256xf32, #tpu.memory_space<vmem>>, vector<1x256xf32>
    %3 = vector.broadcast %2 : vector<1x256xf32> to vector<8x256xf32>
    %4 = arith.mulf %1, %3 : vector<8x256xf32>
    %c16_i32 = arith.constant 16 : i32
    %5 = tpu.dynamic_rotate %0 by %c16_i32 dim 1 : vector<8x256xf32>, i32 -> vector<8x256xf32>
    %c1 = arith.constant 1 : index
    %c0_3 = arith.constant 0 : index
    %6 = vector.load %arg6[%c1, %c0_3] : memref<10x256xf32, #tpu.memory_space<vmem>>, vector<1x256xf32>
    %7 = vector.broadcast %6 : vector<1x256xf32> to vector<8x256xf32>
    %8 = arith.mulf %5, %7 : vector<8x256xf32>
    %c2 = arith.constant 2 : index
    %c0_4 = arith.constant 0 : index
    %9 = vector.load %arg6[%c2, %c0_4] : memref<10x256xf32, #tpu.memory_space<vmem>>, vector<1x256xf32>
    %10 = vector.broadcast %9 : vector<1x256xf32> to vector<8x256xf32>
    %11 = arith.mulf %0, %10 : vector<8x256xf32>
    %c240_i32 = arith.constant 240 : i32
    %12 = tpu.dynamic_rotate %0 by %c240_i32 dim 1 : vector<8x256xf32>, i32 -> vector<8x256xf32>
    %c3 = arith.constant 3 : index
    %c0_5 = arith.constant 0 : index
    %13 = vector.load %arg6[%c3, %c0_5] : memref<10x256xf32, #tpu.memory_space<vmem>>, vector<1x256xf32>
    %14 = vector.broadcast %13 : vector<1x256xf32> to vector<8x256xf32>
    %15 = arith.mulf %12, %14 : vector<8x256xf32>
    %c224_i32 = arith.constant 224 : i32
    %16 = tpu.dynamic_rotate %0 by %c224_i32 dim 1 : vector<8x256xf32>, i32 -> vector<8x256xf32>
    %c4 = arith.constant 4 : index
    %c0_6 = arith.constant 0 : index
    %17 = vector.load %arg6[%c4, %c0_6] : memref<10x256xf32, #tpu.memory_space<vmem>>, vector<1x256xf32>
    %18 = vector.broadcast %17 : vector<1x256xf32> to vector<8x256xf32>
    %19 = arith.mulf %16, %18 : vector<8x256xf32>
    %c2_i32 = arith.constant 2 : i32
    %20 = tpu.dynamic_rotate %4 by %c2_i32 dim 1 : vector<8x256xf32>, i32 -> vector<8x256xf32>
    %c0_7 = arith.constant 0 : index
    %c0_8 = arith.constant 0 : index
    %21 = vector.load %arg2[%c0_7, %c0_8] : memref<8x25xf32, #tpu.memory_space<vmem>>, vector<8x1xf32>
    %22 = vector.broadcast %21 : vector<8x1xf32> to vector<8x256xf32>
    %23 = arith.mulf %20, %22 : vector<8x256xf32>
    %c2_i32_9 = arith.constant 2 : i32
    %24 = tpu.dynamic_rotate %8 by %c2_i32_9 dim 1 : vector<8x256xf32>, i32 -> vector<8x256xf32>
    %c0_10 = arith.constant 0 : index
    %c5 = arith.constant 5 : index
    %25 = vector.load %arg2[%c0_10, %c5] : memref<8x25xf32, #tpu.memory_space<vmem>>, vector<8x1xf32>
    %26 = vector.broadcast %25 : vector<8x1xf32> to vector<8x256xf32>
    %27 = arith.mulf %24, %26 : vector<8x256xf32>
    %28 = arith.addf %23, %27 : vector<8x256xf32>
    %c2_i32_11 = arith.constant 2 : i32
    %29 = tpu.dynamic_rotate %11 by %c2_i32_11 dim 1 : vector<8x256xf32>, i32 -> vector<8x256xf32>
    %c0_12 = arith.constant 0 : index
    %c10 = arith.constant 10 : index
    %30 = vector.load %arg2[%c0_12, %c10] : memref<8x25xf32, #tpu.memory_space<vmem>>, vector<8x1xf32>
    %31 = vector.broadcast %30 : vector<8x1xf32> to vector<8x256xf32>
    %32 = arith.mulf %29, %31 : vector<8x256xf32>
    %33 = arith.addf %28, %32 : vector<8x256xf32>
    %c2_i32_13 = arith.constant 2 : i32
    %34 = tpu.dynamic_rotate %15 by %c2_i32_13 dim 1 : vector<8x256xf32>, i32 -> vector<8x256xf32>
    %c0_14 = arith.constant 0 : index
    %c15 = arith.constant 15 : index
    %35 = vector.load %arg2[%c0_14, %c15] : memref<8x25xf32, #tpu.memory_space<vmem>>, vector<8x1xf32>
    %36 = vector.broadcast %35 : vector<8x1xf32> to vector<8x256xf32>
    %37 = arith.mulf %34, %36 : vector<8x256xf32>
    %38 = arith.addf %33, %37 : vector<8x256xf32>
    %c2_i32_15 = arith.constant 2 : i32
    %39 = tpu.dynamic_rotate %19 by %c2_i32_15 dim 1 : vector<8x256xf32>, i32 -> vector<8x256xf32>
    %c0_16 = arith.constant 0 : index
    %c20 = arith.constant 20 : index
    %40 = vector.load %arg2[%c0_16, %c20] : memref<8x25xf32, #tpu.memory_space<vmem>>, vector<8x1xf32>
    %41 = vector.broadcast %40 : vector<8x1xf32> to vector<8x256xf32>
    %42 = arith.mulf %39, %41 : vector<8x256xf32>
    %43 = arith.addf %38, %42 : vector<8x256xf32>
    %c5_17 = arith.constant 5 : index
    %c0_18 = arith.constant 0 : index
    %44 = vector.load %arg6[%c5_17, %c0_18] : memref<10x256xf32, #tpu.memory_space<vmem>>, vector<1x256xf32>
    %45 = vector.broadcast %44 : vector<1x256xf32> to vector<8x256xf32>
    %46 = arith.mulf %43, %45 : vector<8x256xf32>
    %c1_i32 = arith.constant 1 : i32
    %47 = tpu.dynamic_rotate %4 by %c1_i32 dim 1 : vector<8x256xf32>, i32 -> vector<8x256xf32>
    %c0_19 = arith.constant 0 : index
    %c1_20 = arith.constant 1 : index
    %48 = vector.load %arg2[%c0_19, %c1_20] : memref<8x25xf32, #tpu.memory_space<vmem>>, vector<8x1xf32>
    %49 = vector.broadcast %48 : vector<8x1xf32> to vector<8x256xf32>
    %50 = arith.mulf %47, %49 : vector<8x256xf32>
    %c1_i32_21 = arith.constant 1 : i32
    %51 = tpu.dynamic_rotate %8 by %c1_i32_21 dim 1 : vector<8x256xf32>, i32 -> vector<8x256xf32>
    %c0_22 = arith.constant 0 : index
    %c6 = arith.constant 6 : index
    %52 = vector.load %arg2[%c0_22, %c6] : memref<8x25xf32, #tpu.memory_space<vmem>>, vector<8x1xf32>
    %53 = vector.broadcast %52 : vector<8x1xf32> to vector<8x256xf32>
    %54 = arith.mulf %51, %53 : vector<8x256xf32>
    %55 = arith.addf %50, %54 : vector<8x256xf32>
    %c1_i32_23 = arith.constant 1 : i32
    %56 = tpu.dynamic_rotate %11 by %c1_i32_23 dim 1 : vector<8x256xf32>, i32 -> vector<8x256xf32>
    %c0_24 = arith.constant 0 : index
    %c11 = arith.constant 11 : index
    %57 = vector.load %arg2[%c0_24, %c11] : memref<8x25xf32, #tpu.memory_space<vmem>>, vector<8x1xf32>
    %58 = vector.broadcast %57 : vector<8x1xf32> to vector<8x256xf32>
    %59 = arith.mulf %56, %58 : vector<8x256xf32>
    %60 = arith.addf %55, %59 : vector<8x256xf32>
    %c1_i32_25 = arith.constant 1 : i32
    %61 = tpu.dynamic_rotate %15 by %c1_i32_25 dim 1 : vector<8x256xf32>, i32 -> vector<8x256xf32>
    %c0_26 = arith.constant 0 : index
    %c16 = arith.constant 16 : index
    %62 = vector.load %arg2[%c0_26, %c16] : memref<8x25xf32, #tpu.memory_space<vmem>>, vector<8x1xf32>
    %63 = vector.broadcast %62 : vector<8x1xf32> to vector<8x256xf32>
    %64 = arith.mulf %61, %63 : vector<8x256xf32>
    %65 = arith.addf %60, %64 : vector<8x256xf32>
    %c1_i32_27 = arith.constant 1 : i32
    %66 = tpu.dynamic_rotate %19 by %c1_i32_27 dim 1 : vector<8x256xf32>, i32 -> vector<8x256xf32>
    %c0_28 = arith.constant 0 : index
    %c21 = arith.constant 21 : index
    %67 = vector.load %arg2[%c0_28, %c21] : memref<8x25xf32, #tpu.memory_space<vmem>>, vector<8x1xf32>
    %68 = vector.broadcast %67 : vector<8x1xf32> to vector<8x256xf32>
    %69 = arith.mulf %66, %68 : vector<8x256xf32>
    %70 = arith.addf %65, %69 : vector<8x256xf32>
    %c6_29 = arith.constant 6 : index
    %c0_30 = arith.constant 0 : index
    %71 = vector.load %arg6[%c6_29, %c0_30] : memref<10x256xf32, #tpu.memory_space<vmem>>, vector<1x256xf32>
    %72 = vector.broadcast %71 : vector<1x256xf32> to vector<8x256xf32>
    %73 = arith.mulf %70, %72 : vector<8x256xf32>
    %74 = arith.addf %46, %73 : vector<8x256xf32>
    %c0_31 = arith.constant 0 : index
    %c2_32 = arith.constant 2 : index
    %75 = vector.load %arg2[%c0_31, %c2_32] : memref<8x25xf32, #tpu.memory_space<vmem>>, vector<8x1xf32>
    %76 = vector.broadcast %75 : vector<8x1xf32> to vector<8x256xf32>
    %77 = arith.mulf %4, %76 : vector<8x256xf32>
    %c0_33 = arith.constant 0 : index
    %c7 = arith.constant 7 : index
    %78 = vector.load %arg2[%c0_33, %c7] : memref<8x25xf32, #tpu.memory_space<vmem>>, vector<8x1xf32>
    %79 = vector.broadcast %78 : vector<8x1xf32> to vector<8x256xf32>
    %80 = arith.mulf %8, %79 : vector<8x256xf32>
    %81 = arith.addf %77, %80 : vector<8x256xf32>
    %c0_34 = arith.constant 0 : index
    %c12 = arith.constant 12 : index
    %82 = vector.load %arg2[%c0_34, %c12] : memref<8x25xf32, #tpu.memory_space<vmem>>, vector<8x1xf32>
    %83 = vector.broadcast %82 : vector<8x1xf32> to vector<8x256xf32>
    %84 = arith.mulf %11, %83 : vector<8x256xf32>
    %85 = arith.addf %81, %84 : vector<8x256xf32>
    %c0_35 = arith.constant 0 : index
    %c17 = arith.constant 17 : index
    %86 = vector.load %arg2[%c0_35, %c17] : memref<8x25xf32, #tpu.memory_space<vmem>>, vector<8x1xf32>
    %87 = vector.broadcast %86 : vector<8x1xf32> to vector<8x256xf32>
    %88 = arith.mulf %15, %87 : vector<8x256xf32>
    %89 = arith.addf %85, %88 : vector<8x256xf32>
    %c0_36 = arith.constant 0 : index
    %c22 = arith.constant 22 : index
    %90 = vector.load %arg2[%c0_36, %c22] : memref<8x25xf32, #tpu.memory_space<vmem>>, vector<8x1xf32>
    %91 = vector.broadcast %90 : vector<8x1xf32> to vector<8x256xf32>
    %92 = arith.mulf %19, %91 : vector<8x256xf32>
    %93 = arith.addf %89, %92 : vector<8x256xf32>
    %c7_37 = arith.constant 7 : index
    %c0_38 = arith.constant 0 : index
    %94 = vector.load %arg6[%c7_37, %c0_38] : memref<10x256xf32, #tpu.memory_space<vmem>>, vector<1x256xf32>
    %95 = vector.broadcast %94 : vector<1x256xf32> to vector<8x256xf32>
    %96 = arith.mulf %93, %95 : vector<8x256xf32>
    %97 = arith.addf %74, %96 : vector<8x256xf32>
    %c255_i32 = arith.constant 255 : i32
    %98 = tpu.dynamic_rotate %4 by %c255_i32 dim 1 : vector<8x256xf32>, i32 -> vector<8x256xf32>
    %c0_39 = arith.constant 0 : index
    %c3_40 = arith.constant 3 : index
    %99 = vector.load %arg2[%c0_39, %c3_40] : memref<8x25xf32, #tpu.memory_space<vmem>>, vector<8x1xf32>
    %100 = vector.broadcast %99 : vector<8x1xf32> to vector<8x256xf32>
    %101 = arith.mulf %98, %100 : vector<8x256xf32>
    %c255_i32_41 = arith.constant 255 : i32
    %102 = tpu.dynamic_rotate %8 by %c255_i32_41 dim 1 : vector<8x256xf32>, i32 -> vector<8x256xf32>
    %c0_42 = arith.constant 0 : index
    %c8 = arith.constant 8 : index
    %103 = vector.load %arg2[%c0_42, %c8] : memref<8x25xf32, #tpu.memory_space<vmem>>, vector<8x1xf32>
    %104 = vector.broadcast %103 : vector<8x1xf32> to vector<8x256xf32>
    %105 = arith.mulf %102, %104 : vector<8x256xf32>
    %106 = arith.addf %101, %105 : vector<8x256xf32>
    %c255_i32_43 = arith.constant 255 : i32
    %107 = tpu.dynamic_rotate %11 by %c255_i32_43 dim 1 : vector<8x256xf32>, i32 -> vector<8x256xf32>
    %c0_44 = arith.constant 0 : index
    %c13 = arith.constant 13 : index
    %108 = vector.load %arg2[%c0_44, %c13] : memref<8x25xf32, #tpu.memory_space<vmem>>, vector<8x1xf32>
    %109 = vector.broadcast %108 : vector<8x1xf32> to vector<8x256xf32>
    %110 = arith.mulf %107, %109 : vector<8x256xf32>
    %111 = arith.addf %106, %110 : vector<8x256xf32>
    %c255_i32_45 = arith.constant 255 : i32
    %112 = tpu.dynamic_rotate %15 by %c255_i32_45 dim 1 : vector<8x256xf32>, i32 -> vector<8x256xf32>
    %c0_46 = arith.constant 0 : index
    %c18 = arith.constant 18 : index
    %113 = vector.load %arg2[%c0_46, %c18] : memref<8x25xf32, #tpu.memory_space<vmem>>, vector<8x1xf32>
    %114 = vector.broadcast %113 : vector<8x1xf32> to vector<8x256xf32>
    %115 = arith.mulf %112, %114 : vector<8x256xf32>
    %116 = arith.addf %111, %115 : vector<8x256xf32>
    %c255_i32_47 = arith.constant 255 : i32
    %117 = tpu.dynamic_rotate %19 by %c255_i32_47 dim 1 : vector<8x256xf32>, i32 -> vector<8x256xf32>
    %c0_48 = arith.constant 0 : index
    %c23 = arith.constant 23 : index
    %118 = vector.load %arg2[%c0_48, %c23] : memref<8x25xf32, #tpu.memory_space<vmem>>, vector<8x1xf32>
    %119 = vector.broadcast %118 : vector<8x1xf32> to vector<8x256xf32>
    %120 = arith.mulf %117, %119 : vector<8x256xf32>
    %121 = arith.addf %116, %120 : vector<8x256xf32>
    %c8_49 = arith.constant 8 : index
    %c0_50 = arith.constant 0 : index
    %122 = vector.load %arg6[%c8_49, %c0_50] : memref<10x256xf32, #tpu.memory_space<vmem>>, vector<1x256xf32>
    %123 = vector.broadcast %122 : vector<1x256xf32> to vector<8x256xf32>
    %124 = arith.mulf %121, %123 : vector<8x256xf32>
    %125 = arith.addf %97, %124 : vector<8x256xf32>
    %c254_i32 = arith.constant 254 : i32
    %126 = tpu.dynamic_rotate %4 by %c254_i32 dim 1 : vector<8x256xf32>, i32 -> vector<8x256xf32>
    %c0_51 = arith.constant 0 : index
    %c4_52 = arith.constant 4 : index
    %127 = vector.load %arg2[%c0_51, %c4_52] : memref<8x25xf32, #tpu.memory_space<vmem>>, vector<8x1xf32>
    %128 = vector.broadcast %127 : vector<8x1xf32> to vector<8x256xf32>
    %129 = arith.mulf %126, %128 : vector<8x256xf32>
    %c254_i32_53 = arith.constant 254 : i32
    %130 = tpu.dynamic_rotate %8 by %c254_i32_53 dim 1 : vector<8x256xf32>, i32 -> vector<8x256xf32>
    %c0_54 = arith.constant 0 : index
    %c9 = arith.constant 9 : index
    %131 = vector.load %arg2[%c0_54, %c9] : memref<8x25xf32, #tpu.memory_space<vmem>>, vector<8x1xf32>
    %132 = vector.broadcast %131 : vector<8x1xf32> to vector<8x256xf32>
    %133 = arith.mulf %130, %132 : vector<8x256xf32>
    %134 = arith.addf %129, %133 : vector<8x256xf32>
    %c254_i32_55 = arith.constant 254 : i32
    %135 = tpu.dynamic_rotate %11 by %c254_i32_55 dim 1 : vector<8x256xf32>, i32 -> vector<8x256xf32>
    %c0_56 = arith.constant 0 : index
    %c14 = arith.constant 14 : index
    %136 = vector.load %arg2[%c0_56, %c14] : memref<8x25xf32, #tpu.memory_space<vmem>>, vector<8x1xf32>
    %137 = vector.broadcast %136 : vector<8x1xf32> to vector<8x256xf32>
    %138 = arith.mulf %135, %137 : vector<8x256xf32>
    %139 = arith.addf %134, %138 : vector<8x256xf32>
    %c254_i32_57 = arith.constant 254 : i32
    %140 = tpu.dynamic_rotate %15 by %c254_i32_57 dim 1 : vector<8x256xf32>, i32 -> vector<8x256xf32>
    %c0_58 = arith.constant 0 : index
    %c19 = arith.constant 19 : index
    %141 = vector.load %arg2[%c0_58, %c19] : memref<8x25xf32, #tpu.memory_space<vmem>>, vector<8x1xf32>
    %142 = vector.broadcast %141 : vector<8x1xf32> to vector<8x256xf32>
    %143 = arith.mulf %140, %142 : vector<8x256xf32>
    %144 = arith.addf %139, %143 : vector<8x256xf32>
    %c254_i32_59 = arith.constant 254 : i32
    %145 = tpu.dynamic_rotate %19 by %c254_i32_59 dim 1 : vector<8x256xf32>, i32 -> vector<8x256xf32>
    %c0_60 = arith.constant 0 : index
    %c24 = arith.constant 24 : index
    %146 = vector.load %arg2[%c0_60, %c24] : memref<8x25xf32, #tpu.memory_space<vmem>>, vector<8x1xf32>
    %147 = vector.broadcast %146 : vector<8x1xf32> to vector<8x256xf32>
    %148 = arith.mulf %145, %147 : vector<8x256xf32>
    %149 = arith.addf %144, %148 : vector<8x256xf32>
    %c9_61 = arith.constant 9 : index
    %c0_62 = arith.constant 0 : index
    %150 = vector.load %arg6[%c9_61, %c0_62] : memref<10x256xf32, #tpu.memory_space<vmem>>, vector<1x256xf32>
    %151 = vector.broadcast %150 : vector<1x256xf32> to vector<8x256xf32>
    %152 = arith.mulf %149, %151 : vector<8x256xf32>
    %153 = arith.addf %125, %152 : vector<8x256xf32>
    %c0_63 = arith.constant 0 : index
    %c0_64 = arith.constant 0 : index
    %154 = vector.load %arg3[%c0_63, %c0_64] : memref<8x1xf32, #tpu.memory_space<vmem>>, vector<8x1xf32>
    %155 = vector.broadcast %154 : vector<8x1xf32> to vector<8x256xf32>
    %156 = arith.addf %153, %155 : vector<8x256xf32>
    %cst = arith.constant 0.000000e+00 : f32
    %157 = vector.broadcast %cst : f32 to vector<8x256xf32>
    %158 = arith.maximumf %156, %157 : vector<8x256xf32>
    %159 = vector.extract_strided_slice %158 {offsets = [0, 0], sizes = [1, 256], strides = [1, 1]} : vector<8x256xf32> to vector<1x256xf32>
    %c0_65 = arith.constant 0 : index
    %c0_66 = arith.constant 0 : index
    %160 = vector.load %arg4[%c0_65, %c0_66] : memref<8x4xf32, #tpu.memory_space<vmem>>, vector<8x1xf32>
    %161 = vector.broadcast %159 : vector<1x256xf32> to vector<8x256xf32>
    %162 = vector.broadcast %160 : vector<8x1xf32> to vector<8x256xf32>
    %163 = arith.mulf %161, %162 : vector<8x256xf32>
    %164 = vector.extract_strided_slice %158 {offsets = [1, 0], sizes = [1, 256], strides = [1, 1]} : vector<8x256xf32> to vector<1x256xf32>
    %c0_67 = arith.constant 0 : index
    %c1_68 = arith.constant 1 : index
    %165 = vector.load %arg4[%c0_67, %c1_68] : memref<8x4xf32, #tpu.memory_space<vmem>>, vector<8x1xf32>
    %166 = vector.broadcast %164 : vector<1x256xf32> to vector<8x256xf32>
    %167 = vector.broadcast %165 : vector<8x1xf32> to vector<8x256xf32>
    %168 = arith.mulf %166, %167 : vector<8x256xf32>
    %169 = arith.addf %163, %168 : vector<8x256xf32>
    %170 = vector.extract_strided_slice %158 {offsets = [2, 0], sizes = [1, 256], strides = [1, 1]} : vector<8x256xf32> to vector<1x256xf32>
    %c0_69 = arith.constant 0 : index
    %c2_70 = arith.constant 2 : index
    %171 = vector.load %arg4[%c0_69, %c2_70] : memref<8x4xf32, #tpu.memory_space<vmem>>, vector<8x1xf32>
    %172 = vector.broadcast %170 : vector<1x256xf32> to vector<8x256xf32>
    %173 = vector.broadcast %171 : vector<8x1xf32> to vector<8x256xf32>
    %174 = arith.mulf %172, %173 : vector<8x256xf32>
    %175 = arith.addf %169, %174 : vector<8x256xf32>
    %176 = vector.extract_strided_slice %158 {offsets = [3, 0], sizes = [1, 256], strides = [1, 1]} : vector<8x256xf32> to vector<1x256xf32>
    %c0_71 = arith.constant 0 : index
    %c3_72 = arith.constant 3 : index
    %177 = vector.load %arg4[%c0_71, %c3_72] : memref<8x4xf32, #tpu.memory_space<vmem>>, vector<8x1xf32>
    %178 = vector.broadcast %176 : vector<1x256xf32> to vector<8x256xf32>
    %179 = vector.broadcast %177 : vector<8x1xf32> to vector<8x256xf32>
    %180 = arith.mulf %178, %179 : vector<8x256xf32>
    %181 = arith.addf %175, %180 : vector<8x256xf32>
    %c0_73 = arith.constant 0 : index
    %c0_74 = arith.constant 0 : index
    %182 = vector.load %arg5[%c0_73, %c0_74] : memref<8x1xf32, #tpu.memory_space<vmem>>, vector<8x1xf32>
    %183 = vector.broadcast %182 : vector<8x1xf32> to vector<8x256xf32>
    %184 = arith.addf %181, %183 : vector<8x256xf32>
    %c0_75 = arith.constant 0 : index
    %c0_76 = arith.constant 0 : index
    %185 = vector.load %arg7[%c0_75, %c0_76] : memref<16x256xf32, #tpu.memory_space<vmem>>, vector<8x256xf32>
    tpu.vector_store %arg7[%c0_75, %c0_76], %184 {strides = array<i32>} : memref<16x256xf32, #tpu.memory_space<vmem>>, vector<8x256xf32>,
    %186 = vector.extract_strided_slice %158 {offsets = [4, 0], sizes = [1, 256], strides = [1, 1]} : vector<8x256xf32> to vector<1x256xf32>
    %c0_77 = arith.constant 0 : index
    %c0_78 = arith.constant 0 : index
    %187 = vector.load %arg4[%c0_77, %c0_78] : memref<8x4xf32, #tpu.memory_space<vmem>>, vector<8x1xf32>
    %188 = vector.broadcast %186 : vector<1x256xf32> to vector<8x256xf32>
    %189 = vector.broadcast %187 : vector<8x1xf32> to vector<8x256xf32>
    %190 = arith.mulf %188, %189 : vector<8x256xf32>
    %191 = vector.extract_strided_slice %158 {offsets = [5, 0], sizes = [1, 256], strides = [1, 1]} : vector<8x256xf32> to vector<1x256xf32>
    %c0_79 = arith.constant 0 : index
    %c1_80 = arith.constant 1 : index
    %192 = vector.load %arg4[%c0_79, %c1_80] : memref<8x4xf32, #tpu.memory_space<vmem>>, vector<8x1xf32>
    %193 = vector.broadcast %191 : vector<1x256xf32> to vector<8x256xf32>
    %194 = vector.broadcast %192 : vector<8x1xf32> to vector<8x256xf32>
    %195 = arith.mulf %193, %194 : vector<8x256xf32>
    %196 = arith.addf %190, %195 : vector<8x256xf32>
    %197 = vector.extract_strided_slice %158 {offsets = [6, 0], sizes = [1, 256], strides = [1, 1]} : vector<8x256xf32> to vector<1x256xf32>
    %c0_81 = arith.constant 0 : index
    %c2_82 = arith.constant 2 : index
    %198 = vector.load %arg4[%c0_81, %c2_82] : memref<8x4xf32, #tpu.memory_space<vmem>>, vector<8x1xf32>
    %199 = vector.broadcast %197 : vector<1x256xf32> to vector<8x256xf32>
    %200 = vector.broadcast %198 : vector<8x1xf32> to vector<8x256xf32>
    %201 = arith.mulf %199, %200 : vector<8x256xf32>
    %202 = arith.addf %196, %201 : vector<8x256xf32>
    %203 = vector.extract_strided_slice %158 {offsets = [7, 0], sizes = [1, 256], strides = [1, 1]} : vector<8x256xf32> to vector<1x256xf32>
    %c0_83 = arith.constant 0 : index
    %c3_84 = arith.constant 3 : index
    %204 = vector.load %arg4[%c0_83, %c3_84] : memref<8x4xf32, #tpu.memory_space<vmem>>, vector<8x1xf32>
    %205 = vector.broadcast %203 : vector<1x256xf32> to vector<8x256xf32>
    %206 = vector.broadcast %204 : vector<8x1xf32> to vector<8x256xf32>
    %207 = arith.mulf %205, %206 : vector<8x256xf32>
    %208 = arith.addf %202, %207 : vector<8x256xf32>
    %c0_85 = arith.constant 0 : index
    %c0_86 = arith.constant 0 : index
    %209 = vector.load %arg5[%c0_85, %c0_86] : memref<8x1xf32, #tpu.memory_space<vmem>>, vector<8x1xf32>
    %210 = vector.broadcast %209 : vector<8x1xf32> to vector<8x256xf32>
    %211 = arith.addf %208, %210 : vector<8x256xf32>
    %c8_87 = arith.constant 8 : index
    %c0_88 = arith.constant 0 : index
    %212 = vector.load %arg7[%c8_87, %c0_88] : memref<16x256xf32, #tpu.memory_space<vmem>>, vector<8x256xf32>
    tpu.vector_store %arg7[%c8_87, %c0_88], %211 {strides = array<i32>} : memref<16x256xf32, #tpu.memory_space<vmem>>, vector<8x256xf32>,
    return
  }
  func.func @transform_0(%arg0: i32) -> (i32, i32) {
    %c0_i32 = arith.constant 0 : i32
    %c0_i32_0 = arith.constant 0 : i32
    return %arg0, %c0_i32 : i32, i32
  }
  func.func @transform_1(%arg0: i32) -> (i32, i32) {
    %c0_i32 = arith.constant 0 : i32
    %c0_i32_0 = arith.constant 0 : i32
    %c0_i32_1 = arith.constant 0 : i32
    return %c0_i32, %c0_i32_0 : i32, i32
  }
  func.func @transform_2(%arg0: i32) -> (i32, i32) {
    %c0_i32 = arith.constant 0 : i32
    %c0_i32_0 = arith.constant 0 : i32
    %c0_i32_1 = arith.constant 0 : i32
    return %c0_i32, %c0_i32_0 : i32, i32
  }
  func.func @transform_3(%arg0: i32) -> (i32, i32) {
    %c0_i32 = arith.constant 0 : i32
    %c0_i32_0 = arith.constant 0 : i32
    %c0_i32_1 = arith.constant 0 : i32
    return %c0_i32, %c0_i32_0 : i32, i32
  }
  func.func @transform_4(%arg0: i32) -> (i32, i32) {
    %c0_i32 = arith.constant 0 : i32
    %c0_i32_0 = arith.constant 0 : i32
    %c0_i32_1 = arith.constant 0 : i32
    return %c0_i32, %c0_i32_0 : i32, i32
  }
  func.func @transform_5(%arg0: i32) -> (i32, i32) {
    %c0_i32 = arith.constant 0 : i32
    %c0_i32_0 = arith.constant 0 : i32
    %c0_i32_1 = arith.constant 0 : i32
    return %c0_i32, %c0_i32_0 : i32, i32
  }
  func.func @transform_6(%arg0: i32) -> (i32, i32) {
    %c0_i32 = arith.constant 0 : i32
    %c0_i32_0 = arith.constant 0 : i32
    return %arg0, %c0_i32 : i32, i32
  }
}

</mosaic_0001>

<bundles_post_ra>
// kernel: head_forward.1
= control target key start
LH: loop header
LB: loop body
LE: loop exit
PB: predicated region body
PF: predicated region fallthrough
CT: control target
= control target key end

     0   :  { %v659_v1 = vmov 0   ;;  %s660_s23 = smov 16   ;;  %s661_s24 = smov 32   ;;  %v663_v2 = vmov 2   ;;  %v664_v3 = vmov 7   ;;  %v668_v11 = vmov 5   ;;  %s1100_s0 = inlined_call_operand.vmem [shape: f32[8,256], index: 0, kind: input, shape index: {}]   ;;  %s1101_s5 = inlined_call_operand.vmem [shape: f32[10,256], index: 5, kind: input, shape index: {}]   ;;  %s1102_s1 = inlined_call_operand.vmem [shape: f32[8,25], index: 1, kind: input, shape index: {}]   ;;  %s1103_s3 = inlined_call_operand.vmem [shape: f32[8,4], index: 3, kind: input, shape index: {}]   ;;  %s1104_s4 = inlined_call_operand.vmem [shape: f32[8,1], index: 4, kind: input, shape index: {}]   ;;  %s1105_s2 = inlined_call_operand.vmem [shape: f32[8,1], index: 2, kind: input, shape index: {}]   ;;  %s1106_s6 = inlined_call_operand.vmem [shape: f32[16,256], index: 6, kind: output, shape index: {}]  }
   0x1   :  { %v23_v0 = vld [vmem:[%s1100_s0] sm:$0xff]  ;;  %624 = vset.pattern.permute.xlu1 %v659_v1  ;;  %s662_s25 = smov 112   ;;  %634 = vset.pattern.permute.xlu2 %v663_v2  ;;  %v24_v4 = vld [vmem:[%s1100_s0 + $0x8] sm:$0xff]  ;;  %s665_s30 = smov 96   ;;  %v669_v12 = vmov 10   ;;  %v670_v13 = vmov 17   ;;  %v29_v21 = vlaneseq }
   0x2   :  { %42 = vrot.lane.b32.xlu1 %v23_v0, %s660_s23  ;;  %25 = vrot.lane.b32.xlu0 %v23_v0, %s661_s24  ;;  %v583_v5 = vld [vmem:[%s1101_s5 + $0x2] ss:$8 sm:$0x3]  ;;  %s666_s7 = smov 2   ;;  %s667_s9 = smov 1   ;;  %v671_v14 = vmov 15  }
   0x3   :  { %67 = vrot.lane.b32.xlu2 %v23_v0, %s662_s25  ;;  %635 = vset.pattern.permute.xlu0 %v664_v3  ;;  %v61_v6 = vperm.slane %v583_v5, 0  ;;  %v62_v8 = vperm.slane %v583_v5, 1  ;;  %v747_v10 = vld [vmem:[%s1102_s1] sm:$0xff]  ;;  %v672_v15 = vmov 20   ;;  %v673_v16 = vmov 1   ;;  %s687_s17 = smov 127  }
   0x4   :  { %v674_v17 = vmov 6   ;;  %v675_v18 = vmov 11   ;;  %v676_v19 = vmov 16   ;;  %v677_v20 = vmov 21  }
   0x5   :  { %v738_v7 = vmul.f32 %v61_v6, %v23_v0  ;;  %v742_v9 = vmul.f32 %v62_v8, %v24_v4  ;;  %v678_v22 = vmov 12   ;;  %v772_v26 = vand.u32 127, %v29_v21  ;;  %v34_v27 = vld [vmem:[%s1101_s5] ss:$8 sm:$0x3] }
   0x6   :  { %v36_v28 = vperm.slane %v34_v27, 0  ;;  %v37_v29 = vperm.slane %v34_v27, 1  ;;  %v679_v30 = vmov 22   ;;  %v582_v37 = vld [vmem:[%s1101_s5 + $0x1] ss:$8 sm:$0x3] }
   0x7   :  { %vm31_vm0 = vcmp.lt.s32.totalorder %v772_v26, 32  ;;  %vm46_vm1 = vcmp.lt.s32.totalorder %v772_v26, 16  ;;  %v52_v39 = vperm.slane %v582_v37, 0  ;;  %v53_v40 = vperm.slane %v582_v37, 1 }
   0x8   :  { %v680_v45 = vmov 3   ;;  %v584_v48 = vld [vmem:[%s1101_s5 + $0x3] ss:$8 sm:$0x3]  ;;  %vm71_vm2 = vcmp.lt.s32.totalorder %v772_v26, 112  ;;  %vm103_vm3 = vcmp.lt.s32.totalorder %v772_v26, 2 }
   0x9   :  { %v77_v49 = vperm.slane %v584_v48, 0  ;;  %v78_v50 = vperm.slane %v584_v48, 1  ;;  %v585_v56 = vld [vmem:[%s1101_s5 + $0x4] ss:$8 sm:$0x3]  ;;  %vm87_vm4 = vcmp.lt.s32.totalorder %v772_v26, 96 }
   0xa   :  { %44 = vrot.lane.b32.xlu1 %v24_v4, %s660_s23  ;;  %27 = vrot.lane.b32.xlu0 %v24_v4, %s661_s24  ;;  %v681_v61 = vmov 8   ;;  %v93_v62 = vperm.slane %v585_v56, 0  ;;  %v94_v63 = vperm.slane %v585_v56, 1  ;;  %vm183_vm5 = vcmp.lt.s32.totalorder %v772_v26, 1 }
   0xb   :  { %69 = vrot.lane.b32.xlu2 %v24_v4, %s662_s25  ;;  %v684_v21 = vmov 23   ;;  %vm312_vm6 = vcmp.lt.s32.totalorder %v772_v26, 127  ;;  %vm392_vm7 = vcmp.lt.s32.totalorder %v772_v26, 126 }
  0x12   :  { %85 = vrot.lane.b32.xlu1 %v24_v4, %s665_s30  ;;  %83 = vrot.lane.b32.xlu0 %v23_v0, %s665_s30 }
  0x13   :  { %128 = vrot.lane.b32.xlu2 %v738_v7, %s666_s7 }
  0x1a   :  { %109 = vperm.xlu1 %624, %v747_v10   ;;  %130 = vrot.lane.b32.xlu0 %v742_v9, %s666_s7 }
  0x1b   :  { %206 = vrot.lane.b32.xlu2 %v738_v7, %s667_s9 }
  0x22   :  { %625 = vset.pattern.permute.xlu1 %v668_v11  ;;  %208 = vrot.lane.b32.xlu0 %v742_v9, %s667_s9 }
  0x23   :  { %121 = vperm.xlu1 %625, %v747_v10   ;;  %260 = vperm.xlu2 %634, %v747_v10  }
  0x2a   :  { %266 = vperm.xlu0 %635, %v747_v10  }
  0x2b   :  { %626 = vset.pattern.permute.xlu1 %v669_v12  ;;  %637 = vset.pattern.permute.xlu2 %v670_v13 }
  0x2c   :  { %135 = vperm.xlu1 %626, %v747_v10   ;;  %282 = vperm.xlu2 %637, %v747_v10  }
  0x32   :  { %650 = vset.pattern.permute.xlu0 %v659_v1 }
  0x34   :  { %627 = vset.pattern.permute.xlu1 %v671_v14  ;;  %649 = vset.pattern.permute.xlu2 %v659_v1  ;;  %v682_v14 = vmov 13  }
  0x35   :  { %149 = vperm.xlu1 %627, %v747_v10  }
  0x3d   :  { %628 = vset.pattern.permute.xlu1 %v672_v15 }
  0x3e   :  { %163 = vperm.xlu1 %628, %v747_v10  }
  0x46   :  { %629 = vset.pattern.permute.xlu1 %v673_v16 }
  0x47   :  { %187 = vperm.xlu1 %629, %v747_v10  }
  0x4f   :  { %630 = vset.pattern.permute.xlu1 %v674_v17 }
  0x50   :  { %199 = vperm.xlu1 %630, %v747_v10  }
  0x58   :  { %631 = vset.pattern.permute.xlu1 %v675_v18 }
  0x59   :  { %213 = vperm.xlu1 %631, %v747_v10  }
  0x5d   :  { %v68_v25 = vpop.permute.xlu2 %67 }
  0x61   :  { %632 = vset.pattern.permute.xlu1 %v676_v19  ;;  %v683_v19 = vmov 18  }
  0x62   :  { %227 = vperm.xlu1 %632, %v747_v10  }
  0x65   :  { %v70_v38 = vpop.permute.xlu2 %69 }
  0x66   :  { %v72_v52 = vsel %vm71_vm2, %v68_v25, %v70_v38  ;;  %v73_v53 = vsel %vm71_vm2, %v70_v38, %v68_v25  ;;  %v686_v25 = vmov 9   ;;  %v690_v38 = vmov 24  }
  0x67   :  { %v815_v59 = vmul.f32 %v77_v49, %v72_v52  ;;  %v817_v60 = vmul.f32 %v78_v50, %v73_v53 }
  0x6a   :  { %633 = vset.pattern.permute.xlu1 %v677_v20 }
  0x6b   :  { %241 = vperm.xlu1 %633, %v747_v10  }
  0x6d   :  { %v129_v51 = vpop.permute.xlu2 %128 }
  0x73   :  { %636 = vset.pattern.permute.xlu1 %v678_v22 }
  0x74   :  { %274 = vperm.xlu1 %636, %v747_v10   ;;  %v43_v23 = vpop.permute.xlu1 %42  ;;  %v26_v24 = vpop.permute.xlu0 %25 }
  0x75   :  { %v207_v4 = vpop.permute.xlu2 %206 }
  0x7c   :  { %638 = vset.pattern.permute.xlu1 %v679_v30  ;;  %v45_v31 = vpop.permute.xlu1 %44  ;;  %v28_v32 = vpop.permute.xlu0 %27 }
  0x7d   :  { %v32_v33 = vsel %vm31_vm0, %v26_v24, %v28_v32  ;;  %v33_v34 = vsel %vm31_vm0, %v28_v32, %v26_v24  ;;  %290 = vperm.xlu1 %638, %v747_v10   ;;  %v47_v41 = vsel %vm46_vm1, %v43_v23, %v45_v31  ;;  %v48_v42 = vsel %vm46_vm1, %v45_v31, %v43_v23 }
  0x7e   :  { %v779_v35 = vmul.f32 %v36_v28, %v33_v34  ;;  %v781_v36 = vmul.f32 %v37_v29, %v32_v33  ;;  %v792_v46 = vmul.f32 %v52_v39, %v48_v42  ;;  %v794_v47 = vmul.f32 %v53_v40, %v47_v41  ;;  %v261_v29 = vpop.permute.xlu2 %260  ;;  %v903_v41 = vld [vmem:[%s1103_s3] sm:$0xff]  ;;  %s691_s3 = smov 126  }
  0x7f   :  { %v685_v23 = vmov 4   ;;  %v688_v28 = vmov 14   ;;  %v689_v33 = vmov 19  }
  0x80   :  { %101 = vrot.lane.b32.xlu0 %v781_v36, %s666_s7  ;;  %99 = vrot.lane.b32.xlu2 %v779_v35, %s666_s7  ;;  %v263_v48 = vmul.f32 %v261_v29, %v779_v35  ;;  %v264_v49 = vmul.f32 %v261_v29, %v781_v36  ;;  %v956_v29 = vld [vmem:[%s1104_s4] sm:$0xff] }
  0x84   :  { %v84_v43 = vpop.permute.xlu0 %83  ;;  %v86_v44 = vpop.permute.xlu1 %85 }
  0x85   :  { %639 = vset.pattern.permute.xlu1 %v680_v45  ;;  %v88_v0 = vsel %vm87_vm4, %v84_v43, %v86_v44  ;;  %v89_v3 = vsel %vm87_vm4, %v86_v44, %v84_v43 }
  0x86   :  { %316 = vperm.xlu1 %639, %v747_v10   ;;  %v826_v5 = vmul.f32 %v93_v62, %v88_v0  ;;  %v828_v6 = vmul.f32 %v94_v63, %v89_v3  ;;  %v283_v34 = vpop.permute.xlu2 %282 }
  0x88   :  { %116 = vrot.lane.b32.xlu0 %v794_v47, %s666_s7  ;;  %114 = vrot.lane.b32.xlu2 %v792_v46, %s666_s7 }
  0x8c   :  { %v131_v54 = vpop.permute.xlu0 %130  ;;  %v806_v55 = vpop.permute.xlu1 %109 }
  0x8d   :  { %v132_v57 = vsel %vm103_vm3, %v129_v51, %v131_v54  ;;  %v133_v58 = vsel %vm103_vm3, %v131_v54, %v129_v51 }
  0x8e   :  { %640 = vset.pattern.permute.xlu1 %v681_v61  ;;  %v286_v61 = vmul.f32 %v283_v34, %v817_v60 }
  0x8f   :  { %328 = vperm.xlu1 %640, %v747_v10  }
  0x90   :  { %144 = vrot.lane.b32.xlu0 %v817_v60, %s666_s7  ;;  %142 = vrot.lane.b32.xlu2 %v815_v59, %s666_s7 }
  0x94   :  { %v209_v8 = vpop.permute.xlu0 %208 }
  0x95   :  { %v210_v11 = vsel %vm183_vm5, %v207_v4, %v209_v8  ;;  %v211_v12 = vsel %vm183_vm5, %v209_v8, %v207_v4  ;;  %v834_v13 = vpop.permute.xlu1 %121 }
  0x97   :  { %641 = vset.pattern.permute.xlu1 %v682_v14 }
  0x98   :  { %158 = vrot.lane.b32.xlu0 %v828_v6, %s666_s7  ;;  %156 = vrot.lane.b32.xlu2 %v826_v5, %s666_s7 }
  0x99   :  { %342 = vperm.xlu1 %641, %v747_v10  }
  0x9c   :  { %v267_v42 = vpop.permute.xlu0 %266 }
  0x9d   :  { %v270_v44 = vmul.f32 %v267_v42, %v794_v47 }
  0x9e   :  { %v136_v15 = vpop.permute.xlu1 %135 }
  0x9f   :  { %v841_v17 = vmul.f32 %v136_v15, %v133_v58  ;;  %v843_v18 = vmul.f32 %v136_v15, %v132_v57  ;;  %v272_v52 = vadd.f32 %v270_v44, %v264_v49  ;;  %v285_v58 = vmul.f32 %v283_v34, %v815_v59 }
  0xa0   :  { %181 = vrot.lane.b32.xlu0 %v781_v36, %s667_s9  ;;  %179 = vrot.lane.b32.xlu2 %v779_v35, %s667_s9 }
  0xa1   :  { %642 = vset.pattern.permute.xlu1 %v683_v19 }
  0xa2   :  { %356 = vperm.xlu1 %642, %v747_v10  }
  0xa7   :  { %v850_v20 = vpop.permute.xlu1 %149 }
  0xa8   :  { %194 = vrot.lane.b32.xlu0 %v794_v47, %s667_s9  ;;  %192 = vrot.lane.b32.xlu2 %v792_v46, %s667_s9 }
  0xaa   :  { %643 = vset.pattern.permute.xlu1 %v684_v21 }
  0xab   :  { %370 = vperm.xlu1 %643, %v747_v10  }
  0xb0   :  { %222 = vrot.lane.b32.xlu0 %v817_v60, %s667_s9  ;;  %220 = vrot.lane.b32.xlu2 %v815_v59, %s667_s9  ;;  %v861_v22 = vpop.permute.xlu1 %163 }
  0xb3   :  { %644 = vset.pattern.permute.xlu1 %v685_v23 }
  0xb4   :  { %396 = vperm.xlu1 %644, %v747_v10  }
  0xb8   :  { %236 = vrot.lane.b32.xlu0 %v828_v6, %s667_s9  ;;  %234 = vrot.lane.b32.xlu2 %v826_v5, %s667_s9 }
  0xb9   :  { %v868_v24 = vpop.permute.xlu1 %187 }
  0xbc   :  { %645 = vset.pattern.permute.xlu1 %v686_v25 }
  0xbd   :  { %408 = vperm.xlu1 %645, %v747_v10  }
  0xc0   :  { %310 = vrot.lane.b32.xlu0 %v781_v36, %s687_s17  ;;  %308 = vrot.lane.b32.xlu2 %v779_v35, %s687_s17 }
  0xc2   :  { %v875_v27 = vpop.permute.xlu1 %199 }
  0xc5   :  { %646 = vset.pattern.permute.xlu1 %v688_v28 }
  0xc6   :  { %422 = vperm.xlu1 %646, %v747_v10  }
  0xc8   :  { %323 = vrot.lane.b32.xlu0 %v794_v47, %s687_s17  ;;  %321 = vrot.lane.b32.xlu2 %v792_v46, %s687_s17 }
  0xcb   :  { %v214_v30 = vpop.permute.xlu1 %213 }
  0xcc   :  { %v882_v31 = vmul.f32 %v214_v30, %v211_v12  ;;  %v884_v32 = vmul.f32 %v214_v30, %v210_v11 }
  0xce   :  { %647 = vset.pattern.permute.xlu1 %v689_v33 }
  0xcf   :  { %436 = vperm.xlu1 %647, %v747_v10  }
  0xd0   :  { %337 = vrot.lane.b32.xlu0 %v742_v9, %s687_s17  ;;  %335 = vrot.lane.b32.xlu2 %v738_v7, %s687_s17 }
  0xd4   :  { %v891_v37 = vpop.permute.xlu1 %227 }
  0xd7   :  { %648 = vset.pattern.permute.xlu1 %v690_v38 }
  0xd8   :  { %351 = vrot.lane.b32.xlu0 %v817_v60, %s687_s17  ;;  %349 = vrot.lane.b32.xlu2 %v815_v59, %s687_s17 }
  0xd9   :  { %450 = vperm.xlu1 %648, %v747_v10   ;;  %v269_v10 = vmul.f32 %v267_v42, %v792_v46 }
  0xda   :  { %v100_v39 = vpop.permute.xlu2 %99 }
  0xdb   :  { %v271_v51 = vadd.f32 %v269_v10, %v263_v48  ;;  %v468_v48 = vld [vmem:[%s1105_s2] sm:$0xff] }
  0xdd   :  { %v898_v40 = vpop.permute.xlu1 %241 }
  0xe0   :  { %365 = vrot.lane.b32.xlu0 %v828_v6, %s687_s17  ;;  %363 = vrot.lane.b32.xlu2 %v826_v5, %s687_s17 }
  0xe1   :  { %651 = vset.pattern.permute.xlu1 %v673_v16 }
  0xe2   :  { %v115_v43 = vpop.permute.xlu2 %114  ;;  %491 = vperm.xlu1 %651, %v903_v41  }
  0xe6   :  { %v275_v50 = vpop.permute.xlu1 %274 }
  0xe7   :  { %v277_v53 = vmul.f32 %v275_v50, %v738_v7  ;;  %v278_v54 = vmul.f32 %v275_v50, %v742_v9 }
  0xe8   :  { %390 = vrot.lane.b32.xlu0 %v781_v36, %s691_s3  ;;  %388 = vrot.lane.b32.xlu2 %v779_v35, %s691_s3 }
  0xe9   :  { %v279_v16 = vadd.f32 %v277_v53, %v271_v51  ;;  %v280_v56 = vadd.f32 %v278_v54, %v272_v52 }
  0xea   :  { %v143_v57 = vpop.permute.xlu2 %142  ;;  %541 = vperm.xlu1 %651, %v903_v41  }
  0xeb   :  { %v287_v63 = vadd.f32 %v285_v58, %v279_v16  ;;  %v288_v0 = vadd.f32 %v286_v61, %v280_v56 }
  0xef   :  { %v291_v62 = vpop.permute.xlu1 %290 }
  0xf0   :  { %v293_v3 = vmul.f32 %v291_v62, %v826_v5  ;;  %v294_v4 = vmul.f32 %v291_v62, %v828_v6  ;;  %403 = vrot.lane.b32.xlu0 %v794_v47, %s691_s3  ;;  %401 = vrot.lane.b32.xlu2 %v792_v46, %s691_s3 }
  0xf2   :  { %v930_v35 = vadd.f32 %v293_v3, %v287_v63  ;;  %v932_v36 = vadd.f32 %v294_v4, %v288_v0  ;;  %v102_v8 = vpop.permute.xlu0 %101  ;;  %v157_v11 = vpop.permute.xlu2 %156  ;;  %654 = vset.pattern.permute.xlu1 %v680_v45 }
  0xf3   :  { %v104_v12 = vsel %vm103_vm3, %v100_v39, %v102_v8  ;;  %v105_v14 = vsel %vm103_vm3, %v102_v8, %v100_v39  ;;  %511 = vperm.xlu1 %654, %v903_v41  }
  0xf4   :  { %v112_v21 = vmul.f32 %v806_v55, %v105_v14  ;;  %v113_v23 = vmul.f32 %v806_v55, %v104_v12 }
  0xf8   :  { %417 = vrot.lane.b32.xlu0 %v742_v9, %s691_s3  ;;  %415 = vrot.lane.b32.xlu2 %v738_v7, %s691_s3 }
  0xfa   :  { %v117_v46 = vpop.permute.xlu0 %116  ;;  %v180_v47 = vpop.permute.xlu2 %179 }
  0xfb   :  { %v118_v15 = vsel %vm103_vm3, %v115_v43, %v117_v46  ;;  %v119_v19 = vsel %vm103_vm3, %v117_v46, %v115_v43  ;;  %656 = vset.pattern.permute.xlu1 %v659_v1 }
  0xfc   :  { %v124_v25 = vmul.f32 %v834_v13, %v119_v19  ;;  %v125_v9 = vmul.f32 %v834_v13, %v118_v15  ;;  %521 = vperm.xlu1 %656, %v956_v29   ;;  %v587_v15 = vld [vmem:[%s1101_s5 + $0x6] ss:$8 sm:$0x3] }
  0xfe   :  { %v126_v28 = vadd.f32 %v124_v25, %v112_v21  ;;  %v127_v7 = vadd.f32 %v125_v9, %v113_v23 }
 0x100   :  { %431 = vrot.lane.b32.xlu0 %v817_v60, %s691_s3  ;;  %429 = vrot.lane.b32.xlu2 %v815_v59, %s691_s3  ;;  %v140_v55 = vadd.f32 %v841_v17, %v126_v28  ;;  %v141_v30 = vadd.f32 %v843_v18, %v127_v7  ;;  %v251_v7 = vperm.slane %v587_v15, 0 }
 0x102   :  { %v145_v13 = vpop.permute.xlu0 %144  ;;  %v193_v33 = vpop.permute.xlu2 %192 }
 0x103   :  { %v146_v34 = vsel %vm103_vm3, %v143_v57, %v145_v13  ;;  %v147_v38 = vsel %vm103_vm3, %v145_v13, %v143_v57 }
 0x104   :  { %v152_v39 = vmul.f32 %v850_v20, %v147_v38  ;;  %v153_v42 = vmul.f32 %v850_v20, %v146_v34 }
 0x106   :  { %v154_v60 = vadd.f32 %v152_v39, %v140_v55  ;;  %v155_v43 = vadd.f32 %v153_v42, %v141_v30  ;;  %v252_v55 = vperm.slane %v587_v15, 1 }
 0x108   :  { %445 = vrot.lane.b32.xlu0 %v828_v6, %s691_s3  ;;  %443 = vrot.lane.b32.xlu2 %v826_v5, %s691_s3  ;;  %v985_v5 = vpop.permute.xlu1 %316 }
 0x10a   :  { %v159_v59 = vpop.permute.xlu0 %158  ;;  %v221_v17 = vpop.permute.xlu2 %220 }
 0x10b   :  { %v160_v18 = vsel %vm103_vm3, %v157_v11, %v159_v59  ;;  %v161_v10 = vsel %vm103_vm3, %v159_v59, %v157_v11 }
 0x10c   :  { %v166_v44 = vmul.f32 %v861_v22, %v161_v10  ;;  %v167_v20 = vmul.f32 %v861_v22, %v160_v18 }
 0x10e   :  { %v168_v6 = vadd.f32 %v166_v44, %v154_v60  ;;  %v169_v49 = vadd.f32 %v167_v20, %v155_v43 }
 0x110   :  { %483 = vperm.xlu0 %650, %v903_v41   ;;  %471 = vperm.xlu2 %649, %v468_v48   ;;  %v998_v57 = vpop.permute.xlu1 %328 }
 0x112   :  { %v182_v50 = vpop.permute.xlu0 %181  ;;  %v235_v51 = vpop.permute.xlu2 %234 }
 0x113   :  { %v184_v52 = vsel %vm183_vm5, %v180_v47, %v182_v50  ;;  %v185_v53 = vsel %vm183_vm5, %v182_v50, %v180_v47 }
 0x114   :  { %v190_v58 = vmul.f32 %v868_v24, %v185_v53  ;;  %v191_v61 = vmul.f32 %v868_v24, %v184_v52 }
 0x118   :  { %653 = vset.pattern.permute.xlu0 %v663_v2  ;;  %533 = vperm.xlu2 %649, %v903_v41   ;;  %v343_v46 = vpop.permute.xlu1 %342 }
 0x119   :  { %551 = vperm.xlu0 %653, %v903_v41  }
 0x11a   :  { %v195_v22 = vpop.permute.xlu0 %194  ;;  %v309_v54 = vpop.permute.xlu2 %308 }
 0x11b   :  { %v196_v16 = vsel %vm183_vm5, %v193_v33, %v195_v22  ;;  %v197_v56 = vsel %vm183_vm5, %v195_v22, %v193_v33 }
 0x11c   :  { %v202_v62 = vmul.f32 %v875_v27, %v197_v56  ;;  %v203_v63 = vmul.f32 %v875_v27, %v196_v16 }
 0x11e   :  { %v204_v0 = vadd.f32 %v202_v62, %v190_v58  ;;  %v205_v3 = vadd.f32 %v203_v63, %v191_v61 }
 0x120   :  { %v218_v4 = vadd.f32 %v882_v31, %v204_v0  ;;  %v219_v8 = vadd.f32 %v884_v32, %v205_v3  ;;  %652 = vset.pattern.permute.xlu2 %v663_v2  ;;  %v586_v2 = vld [vmem:[%s1101_s5 + $0x5] ss:$8 sm:$0x3]  ;;  %v357_v39 = vpop.permute.xlu1 %356 }
 0x121   :  { %501 = vperm.xlu2 %652, %v903_v41   ;;  %658 = vset.pattern.permute.xlu0 %v659_v1  ;;  %v173_v23 = vperm.slane %v586_v2, 0  ;;  %v174_v25 = vperm.slane %v586_v2, 1 }
 0x122   :  { %v223_v11 = vpop.permute.xlu0 %222  ;;  %v322_v12 = vpop.permute.xlu2 %321 }
 0x123   :  { %v224_v24 = vsel %vm183_vm5, %v221_v17, %v223_v11  ;;  %v225_v27 = vsel %vm183_vm5, %v223_v11, %v221_v17  ;;  %v177_v38 = vmul.f32 %v173_v23, %v168_v6  ;;  %v178_v42 = vmul.f32 %v174_v25, %v169_v49 }
 0x124   :  { %v230_v14 = vmul.f32 %v891_v37, %v225_v27  ;;  %v231_v31 = vmul.f32 %v891_v37, %v224_v24  ;;  %v588_v37 = vld [vmem:[%s1101_s5 + $0x7] ss:$8 sm:$0x3] }
 0x125   :  { %v300_v13 = vperm.slane %v588_v37, 0 }
 0x126   :  { %v232_v32 = vadd.f32 %v230_v14, %v218_v4  ;;  %v233_v47 = vadd.f32 %v231_v31, %v219_v8  ;;  %v589_v31 = vld [vmem:[%s1101_s5 + $0x10] ss:$8 sm:$0x3] }
 0x127   :  { %v304_v59 = vmul.f32 %v300_v13, %v930_v35  ;;  %v381_v2 = vperm.slane %v589_v31, 1 }
 0x128   :  { %v371_v50 = vpop.permute.xlu1 %370 }
 0x129   :  { %655 = vset.pattern.permute.xlu2 %v680_v45 }
 0x12a   :  { %v237_v19 = vpop.permute.xlu0 %236  ;;  %v336_v21 = vpop.permute.xlu2 %335  ;;  %561 = vperm.xlu2 %655, %v903_v41   ;;  %v301_v41 = vperm.slane %v588_v37, 1 }
 0x12b   :  { %v238_v9 = vsel %vm183_vm5, %v235_v51, %v237_v19  ;;  %v239_v28 = vsel %vm183_vm5, %v237_v19, %v235_v51 }
 0x12c   :  { %v244_v45 = vmul.f32 %v898_v40, %v239_v28  ;;  %v245_v30 = vmul.f32 %v898_v40, %v238_v9  ;;  %v305_v17 = vmul.f32 %v301_v41, %v932_v36 }
 0x12e   :  { %v246_v33 = vadd.f32 %v244_v45, %v232_v32  ;;  %v247_v34 = vadd.f32 %v245_v30, %v233_v47 }
 0x130   :  { %v255_v60 = vmul.f32 %v251_v7, %v246_v33  ;;  %v256_v43 = vmul.f32 %v252_v55, %v247_v34  ;;  %v397_v62 = vpop.permute.xlu1 %396 }
 0x132   :  { %v257_v18 = vadd.f32 %v255_v60, %v177_v38  ;;  %v258_v10 = vadd.f32 %v256_v43, %v178_v42  ;;  %v311_v44 = vpop.permute.xlu0 %310  ;;  %v350_v20 = vpop.permute.xlu2 %349  ;;  %657 = vset.pattern.permute.xlu2 %v659_v1 }
 0x133   :  { %v313_v40 = vsel %vm312_vm6, %v309_v54, %v311_v44  ;;  %v314_v48 = vsel %vm312_vm6, %v311_v44, %v309_v54  ;;  %571 = vperm.xlu2 %657, %v956_v29  }
 0x134   :  { %v319_v6 = vmul.f32 %v985_v5, %v313_v40  ;;  %v320_v35 = vmul.f32 %v985_v5, %v314_v48  ;;  %v306_v49 = vadd.f32 %v304_v59, %v257_v18  ;;  %v307_v36 = vadd.f32 %v305_v17, %v258_v10 }
 0x138   :  { %v409_v24 = vpop.permute.xlu1 %408 }
 0x13a   :  { %v324_v51 = vpop.permute.xlu0 %323  ;;  %v364_v52 = vpop.permute.xlu2 %363 }
 0x13b   :  { %v325_v1 = vsel %vm312_vm6, %v322_v12, %v324_v51  ;;  %v326_v53 = vsel %vm312_vm6, %v324_v51, %v322_v12 }
 0x13c   :  { %v331_v22 = vmul.f32 %v998_v57, %v325_v1  ;;  %v332_v54 = vmul.f32 %v998_v57, %v326_v53 }
 0x13e   :  { %v333_v29 = vadd.f32 %v331_v22, %v319_v6  ;;  %v334_v16 = vadd.f32 %v332_v54, %v320_v35 }
 0x140   :  { %v423_v7 = vpop.permute.xlu1 %422 }
 0x142   :  { %v338_v56 = vpop.permute.xlu0 %337  ;;  %v389_v58 = vpop.permute.xlu2 %388 }
 0x143   :  { %v339_v5 = vsel %vm312_vm6, %v336_v21, %v338_v56  ;;  %v340_v61 = vsel %vm312_vm6, %v338_v56, %v336_v21  ;;  %v590_v56 = vld [vmem:[%s1101_s5 + $0x11] ss:$8 sm:$0x3] }
 0x144   :  { %v345_v63 = vmul.f32 %v343_v46, %v339_v5  ;;  %v346_v0 = vmul.f32 %v343_v46, %v340_v61  ;;  %v380_v46 = vperm.slane %v589_v31, 0 }
 0x146   :  { %v347_v3 = vadd.f32 %v345_v63, %v333_v29  ;;  %v348_v4 = vadd.f32 %v346_v0, %v334_v16  ;;  %v460_v63 = vperm.slane %v590_v56, 0  ;;  %v461_v0 = vperm.slane %v590_v56, 1 }
 0x148   :  { %v437_v34 = vpop.permute.xlu1 %436 }
 0x14a   :  { %v352_v8 = vpop.permute.xlu0 %351  ;;  %v402_v11 = vpop.permute.xlu2 %401 }
 0x14b   :  { %v353_v57 = vsel %vm312_vm6, %v350_v20, %v352_v8  ;;  %v354_v12 = vsel %vm312_vm6, %v352_v8, %v350_v20 }
 0x14c   :  { %v359_v27 = vmul.f32 %v357_v39, %v353_v57  ;;  %v360_v14 = vmul.f32 %v357_v39, %v354_v12 }
 0x14e   :  { %v361_v21 = vadd.f32 %v359_v27, %v347_v3  ;;  %v362_v37 = vadd.f32 %v360_v14, %v348_v4 }
 0x150   :  { %v451_v60 = vpop.permute.xlu1 %450 }
 0x152   :  { %v366_v32 = vpop.permute.xlu0 %365  ;;  %v416_v47 = vpop.permute.xlu2 %415 }
 0x153   :  { %v367_v15 = vsel %vm312_vm6, %v364_v52, %v366_v32  ;;  %v368_v19 = vsel %vm312_vm6, %v366_v32, %v364_v52 }
 0x154   :  { %v373_v23 = vmul.f32 %v371_v50, %v367_v15  ;;  %v374_v25 = vmul.f32 %v371_v50, %v368_v19 }
 0x156   :  { %v375_v9 = vadd.f32 %v373_v23, %v361_v21  ;;  %v376_v28 = vadd.f32 %v374_v25, %v362_v37 }
 0x158   :  { %v384_v55 = vmul.f32 %v380_v46, %v375_v9  ;;  %v385_v45 = vmul.f32 %v381_v2, %v376_v28  ;;  %v492_v35 = vpop.permute.xlu1 %491 }
 0x15a   :  { %v386_v30 = vadd.f32 %v384_v55, %v306_v49  ;;  %v387_v13 = vadd.f32 %v385_v45, %v307_v36  ;;  %v391_v41 = vpop.permute.xlu0 %390  ;;  %v430_v33 = vpop.permute.xlu2 %429 }
 0x15b   :  { %v393_v10 = vsel %vm392_vm7, %v389_v58, %v391_v41  ;;  %v394_v44 = vsel %vm392_vm7, %v391_v41, %v389_v58 }
 0x15c   :  { %v399_v50 = vmul.f32 %v397_v62, %v393_v10  ;;  %v400_v51 = vmul.f32 %v397_v62, %v394_v44 }
 0x160   :  { %v542_v27 = vpop.permute.xlu1 %541 }
 0x162   :  { %v404_v38 = vpop.permute.xlu0 %403  ;;  %v444_v39 = vpop.permute.xlu2 %443 }
 0x163   :  { %v405_v59 = vsel %vm392_vm7, %v402_v11, %v404_v38  ;;  %v406_v17 = vsel %vm392_vm7, %v404_v38, %v402_v11 }
 0x164   :  { %v411_v48 = vmul.f32 %v409_v24, %v405_v59  ;;  %v412_v6 = vmul.f32 %v409_v24, %v406_v17 }
 0x166   :  { %v413_v53 = vadd.f32 %v411_v48, %v399_v50  ;;  %v414_v22 = vadd.f32 %v412_v6, %v400_v51 }
 0x168   :  { %v512_v23 = vpop.permute.xlu1 %511 }
 0x16a   :  { %v418_v42 = vpop.permute.xlu0 %417  ;;  %v472_v43 = vpop.permute.xlu2 %471 }
 0x16b   :  { %v419_v20 = vsel %vm392_vm7, %v416_v47, %v418_v42  ;;  %v420_v40 = vsel %vm392_vm7, %v418_v42, %v416_v47 }
 0x16c   :  { %v425_v52 = vmul.f32 %v423_v7, %v419_v20  ;;  %v426_v1 = vmul.f32 %v423_v7, %v420_v40 }
 0x16e   :  { %v427_v58 = vadd.f32 %v425_v52, %v413_v53  ;;  %v428_v5 = vadd.f32 %v426_v1, %v414_v22 }
 0x172   :  { %v432_v18 = vpop.permute.xlu0 %431  ;;  %v534_v16 = vpop.permute.xlu2 %533 }
 0x173   :  { %v433_v49 = vsel %vm392_vm7, %v430_v33, %v432_v18  ;;  %v434_v36 = vsel %vm392_vm7, %v432_v18, %v430_v33 }
 0x174   :  { %v439_v54 = vmul.f32 %v437_v34, %v433_v49  ;;  %v440_v29 = vmul.f32 %v437_v34, %v434_v36 }
 0x176   :  { %v441_v4 = vadd.f32 %v439_v54, %v427_v58  ;;  %v442_v8 = vadd.f32 %v440_v29, %v428_v5  ;;  %v522_v58 = vpop.permute.xlu1 %521 }
 0x17a   :  { %v446_v61 = vpop.permute.xlu0 %445 }
 0x17b   :  { %v447_v3 = vsel %vm392_vm7, %v444_v39, %v446_v61  ;;  %v448_v62 = vsel %vm392_vm7, %v446_v61, %v444_v39  ;;  %v502_v32 = vpop.permute.xlu2 %501 }
 0x17c   :  { %v453_v11 = vmul.f32 %v451_v60, %v447_v3  ;;  %v454_v57 = vmul.f32 %v451_v60, %v448_v62 }
 0x17e   :  { %v455_v12 = vadd.f32 %v453_v11, %v441_v4  ;;  %v456_v24 = vadd.f32 %v454_v57, %v442_v8 }
 0x180   :  { %v464_v14 = vmul.f32 %v460_v63, %v455_v12  ;;  %v465_v31 = vmul.f32 %v461_v0, %v456_v24 }
 0x182   :  { %v466_v47 = vadd.f32 %v464_v14, %v386_v30  ;;  %v467_v46 = vadd.f32 %v465_v31, %v387_v13  ;;  %v484_v19 = vpop.permute.xlu0 %483 }
 0x184   :  { %v474_v2 = vadd.f32 %v472_v43, %v466_v47  ;;  %v475_v15 = vadd.f32 %v472_v43, %v467_v46  ;;  %v562_v33 = vpop.permute.xlu2 %561 }
 0x186   :  { %v476_v21 = vmax.f32 %v474_v2, 0.0  ;;  %v477_v37 = vmax.f32 %v475_v15, 0.0 }
 0x188   :  { %v499_v26 = vperm.slane %v477_v37, 2  ;;  %v498_v25 = vperm.slane %v476_v21, 2  ;;  %v479_v9 = vperm.slane %v476_v21, 0  ;;  %v480_v28 = vperm.slane %v477_v37, 0 }
 0x189   :  { %v488_v7 = vperm.slane %v476_v21, 1  ;;  %v489_v55 = vperm.slane %v477_v37, 1  ;;  %v508_v39 = vperm.slane %v476_v21, 3  ;;  %v509_v30 = vperm.slane %v477_v37, 3 }
 0x18a   :  { %v486_v45 = vmul.f32 %v484_v19, %v479_v9  ;;  %v487_v41 = vmul.f32 %v484_v19, %v480_v28  ;;  %v504_v13 = vmul.f32 %v502_v32, %v498_v25  ;;  %v505_v42 = vmul.f32 %v502_v32, %v499_v26 }
 0x18b   :  { %v494_v34 = vmul.f32 %v492_v35, %v488_v7  ;;  %v495_v38 = vmul.f32 %v492_v35, %v489_v55  ;;  %v529_v60 = vperm.slane %v476_v21, 4  ;;  %v530_v43 = vperm.slane %v477_v37, 4  ;;  %v552_v40 = vpop.permute.xlu0 %551 }
 0x18c   :  { %v538_v18 = vperm.slane %v476_v21, 5  ;;  %v539_v10 = vperm.slane %v477_v37, 5  ;;  %v559_v44 = vperm.slane %v477_v37, 7  ;;  %v558_v20 = vperm.slane %v476_v21, 7 }
 0x18d   :  { %v496_v59 = vadd.f32 %v494_v34, %v486_v45  ;;  %v497_v17 = vadd.f32 %v495_v38, %v487_v41  ;;  %v536_v48 = vmul.f32 %v534_v16, %v529_v60  ;;  %v537_v6 = vmul.f32 %v534_v16, %v530_v43  ;;  %v572_v8 = vpop.permute.xlu2 %571 }
 0x18e   :  { %v544_v49 = vmul.f32 %v542_v27, %v538_v18  ;;  %v545_v36 = vmul.f32 %v542_v27, %v539_v10  ;;  %v548_v50 = vperm.slane %v476_v21, 6  ;;  %v549_v51 = vperm.slane %v477_v37, 6 }
 0x18f   :  { %v514_v35 = vmul.f32 %v512_v23, %v508_v39  ;;  %v515_v52 = vmul.f32 %v512_v23, %v509_v30  ;;  %v506_v1 = vadd.f32 %v504_v13, %v496_v59  ;;  %v507_v53 = vadd.f32 %v505_v42, %v497_v17 }
 0x190   :  { %v546_v22 = vadd.f32 %v544_v49, %v536_v48  ;;  %v547_v54 = vadd.f32 %v545_v36, %v537_v6  ;;  %v554_v29 = vmul.f32 %v552_v40, %v548_v50  ;;  %v555_v56 = vmul.f32 %v552_v40, %v549_v51 }
 0x191   :  { %v516_v5 = vadd.f32 %v514_v35, %v506_v1  ;;  %v517_v61 = vadd.f32 %v515_v52, %v507_v53  ;;  %v564_v63 = vmul.f32 %v562_v33, %v558_v20  ;;  %v565_v0 = vmul.f32 %v562_v33, %v559_v44 }
 0x192   :  { %v556_v3 = vadd.f32 %v554_v29, %v546_v22  ;;  %v557_v62 = vadd.f32 %v555_v56, %v547_v54 }
 0x193   :  { %v524_v16 = vadd.f32 %v522_v58, %v516_v5  ;;  %v525_v4 = vadd.f32 %v522_v58, %v517_v61 }
 0x194   :  { %v567_v11 = vadd.f32 %v565_v0, %v557_v62  ;;  %v566_v57 = vadd.f32 %v564_v63, %v556_v3 }
 0x195   :  { %526 = vst [vmem:[%s1106_s6] sm:$0xff] %v524_v16 }
 0x196   :  { %527 = vst [vmem:[%s1106_s6 + $0x8] sm:$0xff] %v525_v4  ;;  %v574_v12 = vadd.f32 %v572_v8, %v566_v57  ;;  %v575_v24 = vadd.f32 %v572_v8, %v567_v11 }
 0x198   :  { %576 = vst [vmem:[%s1106_s6 + $0x10] sm:$0xff] %v574_v12 }
 0x199   :  { %577 = vst [vmem:[%s1106_s6 + $0x18] sm:$0xff] %v575_v24 }

</bundles_post_ra>
